<compile_context>
chip_gen: v7x
topology: tpu7x:2x2x1
jax: 0.10.0
libtpu: 0.0.40
codegen_flags: <defaults>
</compile_context>

<pallas_src>
import functools

import jax
import jax.numpy as jnp
from jax import lax
from jax.experimental import pallas as pl
from jax.experimental.pallas import tpu as pltpu


def _fused_mlp_kernel(
    x_ref,      # (B, In)      VMEM
    ew_ref,     # (In, H)      VMEM  embedding weight
    eb_ref,     # (1, H)       VMEM  embedding bias
    hw_ref,     # (L, H, H)    VMEM  stacked hidden weights
    hb_ref,     # (L, 1, H)    VMEM  stacked hidden biases
    ow_ref,     # (H, Out)     VMEM  output weight
    ob_ref,     # (1, Out)     VMEM  output bias
    o_ref,      # (B, Out)     VMEM  result
    act_ref,    # (B, H)       VMEM scratch: activation carried between layers
    *,
    n_layers,
):
    # Embedding: Linear, no activation.
    act_ref[...] = (
        jnp.dot(x_ref[...], ew_ref[...], preferred_element_type=jnp.float32)
        + eb_ref[...]
    )

    # Hidden layers: Linear + ReLU, activation ping-ponged through VMEM scratch.
    def layer_body(i, carry):
        h = (
            jnp.dot(act_ref[...], hw_ref[i], preferred_element_type=jnp.float32)
            + hb_ref[i]
        )
        act_ref[...] = jnp.maximum(h, 0.0)
        return carry

    lax.fori_loop(0, n_layers, layer_body, 0, unroll=True)

    # Output: Linear + Sigmoid (exp on the EUP slot).
    y = (
        jnp.dot(act_ref[...], ow_ref[...], preferred_element_type=jnp.float32)
        + ob_ref[...]
    )
    o_ref[...] = jax.nn.sigmoid(y).astype(o_ref.dtype)


def fused_mlp(x, ew, eb, hw, hb, ow, ob):
    """Runs the whole MLP in one pallas_call.

    All operands fit comfortably in VMEM (weights total ~256 KiB for the
    default sizes), so every array is a single full-extent VMEM block and
    there is no grid.  If hidden_size is scaled up, add K-tiling (and a
    'parallel' batch axis) before exceeding the 64 MiB VMEM budget on v7x.
    """
    B, _ = x.shape
    H = ew.shape[1]
    N = ow.shape[1]
    L = hw.shape[0]

    kernel = functools.partial(_fused_mlp_kernel, n_layers=L)
    return pl.pallas_call(
        kernel,
        out_shape=jax.ShapeDtypeStruct((B, N), x.dtype),
        in_specs=[pl.BlockSpec(memory_space=pltpu.VMEM)] * 7,
        out_specs=pl.BlockSpec(memory_space=pltpu.VMEM),
        scratch_shapes=[pltpu.VMEM((B, H), jnp.float32)],
    )(x, ew, eb, hw, hb, ow, ob)


def init_mlp_params(key, input_size, hidden_size, output_size, n_layers):
    """Deterministic init mimicking PyTorch nn.Linear default U(-1/sqrt(in), 1/sqrt(in))."""
    params = {}

    def linear_init(k, fan_in, fan_out):
        kw, kb = jax.random.split(k)
        bound = 1.0 / jnp.sqrt(fan_in)
        # store as (in, out) so the kernel does x @ W directly
        w = jax.random.uniform(kw, (fan_in, fan_out), jnp.float32, -bound, bound)
        b = jax.random.uniform(kb, (fan_out,), jnp.float32, -bound, bound)
        return w, b

    keys = jax.random.split(key, n_layers + 2)
    params["embedding"] = linear_init(keys[0], input_size, hidden_size)
    params["linears"] = [
        linear_init(keys[1 + i], hidden_size, hidden_size) for i in range(n_layers)
    ]
    params["output"] = linear_init(keys[n_layers + 1], hidden_size, output_size)
    return params


def mlp_forward(params, x):
    ew, eb = params["embedding"]
    ow, ob = params["output"]
    assert len(params["linears"]) >= 1, "fused kernel expects n_layers >= 1"
    # Stack identically-shaped hidden-layer weights/biases once, outside the kernel.
    hw = jnp.stack([w for w, _ in params["linears"]])                 # (L, H, H)
    hb = jnp.stack([b.reshape(1, -1) for _, b in params["linears"]])  # (L, 1, H)
    eb2 = eb.reshape(1, -1)
    ob2 = ob.reshape(1, -1)
    return fused_mlp(x, ew, eb2, hw, hb, ow, ob2)


if __name__ == "__main__":
    key = jax.random.PRNGKey(0)
    k_params, k_x = jax.random.split(key)

    batch = 8
    input_size = 128
    hidden_size = 128
    output_size = 128
    n_layers = 2

    params = init_mlp_params(k_params, input_size, hidden_size, output_size, n_layers)
    x = jax.random.normal(k_x, (batch, input_size), jnp.float32)

    out = mlp_forward(params, x)
    jax.block_until_ready(out)

    # correctness check against a pure-JAX reference
    def ref_forward(params, x):
        w, b = params["embedding"]
        x = x @ w + b
        for w, b in params["linears"]:
            x = jnp.maximum(x @ w + b, 0.0)
        w, b = params["output"]
        return jax.nn.sigmoid(x @ w + b)

    ref = ref_forward(params, x)
    assert out.shape == (batch, output_size)
    assert jnp.allclose(out, ref, atol=1e-5, rtol=1e-5)

    print("KERNEL_OK")
</pallas_src>

<mosaic_0001>
module attributes {stable_mosaic.version = 11 : i64} {
  func.func @_fused_mlp_kernel(%arg0: memref<8x128xf32, #tpu.memory_space<vmem>>, %arg1: memref<128x128xf32, #tpu.memory_space<vmem>>, %arg2: memref<1x128xf32, #tpu.memory_space<vmem>>, %arg3: memref<2x128x128xf32, #tpu.memory_space<vmem>>, %arg4: memref<2x1x128xf32, #tpu.memory_space<vmem>>, %arg5: memref<128x128xf32, #tpu.memory_space<vmem>>, %arg6: memref<1x128xf32, #tpu.memory_space<vmem>>, %arg7: memref<8x128xf32, #tpu.memory_space<vmem>>, %arg8: memref<8x128xf32, #tpu.memory_space<vmem>>) attributes {dimension_semantics = [], scalar_prefetch = 0 : i64, scratch_operands = 1 : i64, tpu.core_type = #tpu.core_type<tc>} {
    %c0 = arith.constant 0 : index
    %c0_0 = arith.constant 0 : index
    %0 = vector.load %arg0[%c0, %c0_0] : memref<8x128xf32, #tpu.memory_space<vmem>>, vector<8x128xf32>
    %c0_1 = arith.constant 0 : index
    %c0_2 = arith.constant 0 : index
    %1 = vector.load %arg1[%c0_1, %c0_2] : memref<128x128xf32, #tpu.memory_space<vmem>>, vector<128x128xf32>
    %cst = arith.constant dense<0.000000e+00> : vector<8x128xf32>
    %2 = tpu.matmul %0, %1, %cst {dimension_numbers = #tpu.dot_dimension_numbers<[1], [0], [0], [1], [0, 0, 1, 1], [], []>} : vector<8x128xf32>, vector<128x128xf32>, vector<8x128xf32> -> vector<8x128xf32>
    %c0_3 = arith.constant 0 : index
    %c0_4 = arith.constant 0 : index
    %3 = vector.load %arg2[%c0_3, %c0_4] : memref<1x128xf32, #tpu.memory_space<vmem>>, vector<1x128xf32>
    %4 = vector.broadcast %3 : vector<1x128xf32> to vector<8x128xf32>
    %5 = arith.addf %2, %4 : vector<8x128xf32>
    %c0_5 = arith.constant 0 : index
    %c0_6 = arith.constant 0 : index
    %6 = vector.load %arg8[%c0_5, %c0_6] : memref<8x128xf32, #tpu.memory_space<vmem>>, vector<8x128xf32>
    tpu.vector_store %arg8[%c0_5, %c0_6], %5 {strides = array<i32>} : memref<8x128xf32, #tpu.memory_space<vmem>>, vector<8x128xf32>,
    %c0_i32 = arith.constant 0 : i32
    %c0_7 = arith.constant 0 : index
    %c0_8 = arith.constant 0 : index
    %7 = vector.load %arg8[%c0_7, %c0_8] : memref<8x128xf32, #tpu.memory_space<vmem>>, vector<8x128xf32>
    %8 = arith.index_cast %c0_i32 : i32 to index
    %c0_9 = arith.constant 0 : index
    %c0_10 = arith.constant 0 : index
    %9 = vector.load %arg3[%8, %c0_9, %c0_10] : memref<2x128x128xf32, #tpu.memory_space<vmem>>, vector<1x128x128xf32>
    %10 = vector.shape_cast %9 : vector<1x128x128xf32> to vector<128x128xf32>
    %cst_11 = arith.constant dense<0.000000e+00> : vector<8x128xf32>
    %11 = tpu.matmul %7, %10, %cst_11 {dimension_numbers = #tpu.dot_dimension_numbers<[1], [0], [0], [1], [0, 0, 1, 1], [], []>} : vector<8x128xf32>, vector<128x128xf32>, vector<8x128xf32> -> vector<8x128xf32>
    %12 = arith.index_cast %c0_i32 : i32 to index
    %c0_12 = arith.constant 0 : index
    %c0_13 = arith.constant 0 : index
    %13 = vector.load %arg4[%12, %c0_12, %c0_13] : memref<2x1x128xf32, #tpu.memory_space<vmem>>, vector<1x1x128xf32>
    %14 = vector.shape_cast %13 : vector<1x1x128xf32> to vector<1x128xf32>
    %15 = vector.broadcast %14 : vector<1x128xf32> to vector<8x128xf32>
    %16 = arith.addf %11, %15 : vector<8x128xf32>
    %cst_14 = arith.constant 0.000000e+00 : f32
    %17 = vector.broadcast %cst_14 : f32 to vector<8x128xf32>
    %18 = arith.maximumf %16, %17 : vector<8x128xf32>
    %c0_15 = arith.constant 0 : index
    %c0_16 = arith.constant 0 : index
    %19 = vector.load %arg8[%c0_15, %c0_16] : memref<8x128xf32, #tpu.memory_space<vmem>>, vector<8x128xf32>
    tpu.vector_store %arg8[%c0_15, %c0_16], %18 {strides = array<i32>} : memref<8x128xf32, #tpu.memory_space<vmem>>, vector<8x128xf32>,
    %c1_i32 = arith.constant 1 : i32
    %c0_17 = arith.constant 0 : index
    %c0_18 = arith.constant 0 : index
    %20 = vector.load %arg8[%c0_17, %c0_18] : memref<8x128xf32, #tpu.memory_space<vmem>>, vector<8x128xf32>
    %21 = arith.index_cast %c1_i32 : i32 to index
    %c0_19 = arith.constant 0 : index
    %c0_20 = arith.constant 0 : index
    %22 = vector.load %arg3[%21, %c0_19, %c0_20] : memref<2x128x128xf32, #tpu.memory_space<vmem>>, vector<1x128x128xf32>
    %23 = vector.shape_cast %22 : vector<1x128x128xf32> to vector<128x128xf32>
    %cst_21 = arith.constant dense<0.000000e+00> : vector<8x128xf32>
    %24 = tpu.matmul %20, %23, %cst_21 {dimension_numbers = #tpu.dot_dimension_numbers<[1], [0], [0], [1], [0, 0, 1, 1], [], []>} : vector<8x128xf32>, vector<128x128xf32>, vector<8x128xf32> -> vector<8x128xf32>
    %25 = arith.index_cast %c1_i32 : i32 to index
    %c0_22 = arith.constant 0 : index
    %c0_23 = arith.constant 0 : index
    %26 = vector.load %arg4[%25, %c0_22, %c0_23] : memref<2x1x128xf32, #tpu.memory_space<vmem>>, vector<1x1x128xf32>
    %27 = vector.shape_cast %26 : vector<1x1x128xf32> to vector<1x128xf32>
    %28 = vector.broadcast %27 : vector<1x128xf32> to vector<8x128xf32>
    %29 = arith.addf %24, %28 : vector<8x128xf32>
    %cst_24 = arith.constant 0.000000e+00 : f32
    %30 = vector.broadcast %cst_24 : f32 to vector<8x128xf32>
    %31 = arith.maximumf %29, %30 : vector<8x128xf32>
    %c0_25 = arith.constant 0 : index
    %c0_26 = arith.constant 0 : index
    %32 = vector.load %arg8[%c0_25, %c0_26] : memref<8x128xf32, #tpu.memory_space<vmem>>, vector<8x128xf32>
    tpu.vector_store %arg8[%c0_25, %c0_26], %31 {strides = array<i32>} : memref<8x128xf32, #tpu.memory_space<vmem>>, vector<8x128xf32>,
    %c2_i32 = arith.constant 2 : i32
    %c0_27 = arith.constant 0 : index
    %c0_28 = arith.constant 0 : index
    %33 = vector.load %arg8[%c0_27, %c0_28] : memref<8x128xf32, #tpu.memory_space<vmem>>, vector<8x128xf32>
    %c0_29 = arith.constant 0 : index
    %c0_30 = arith.constant 0 : index
    %34 = vector.load %arg5[%c0_29, %c0_30] : memref<128x128xf32, #tpu.memory_space<vmem>>, vector<128x128xf32>
    %cst_31 = arith.constant dense<0.000000e+00> : vector<8x128xf32>
    %35 = tpu.matmul %33, %34, %cst_31 {dimension_numbers = #tpu.dot_dimension_numbers<[1], [0], [0], [1], [0, 0, 1, 1], [], []>} : vector<8x128xf32>, vector<128x128xf32>, vector<8x128xf32> -> vector<8x128xf32>
    %c0_32 = arith.constant 0 : index
    %c0_33 = arith.constant 0 : index
    %36 = vector.load %arg6[%c0_32, %c0_33] : memref<1x128xf32, #tpu.memory_space<vmem>>, vector<1x128xf32>
    %37 = vector.broadcast %36 : vector<1x128xf32> to vector<8x128xf32>
    %38 = arith.addf %35, %37 : vector<8x128xf32>
    %39 = arith.negf %38 : vector<8x128xf32>
    %40 = math.exp %39 : vector<8x128xf32>
    %cst_34 = arith.constant 1.000000e+00 : f32
    %41 = vector.broadcast %cst_34 : f32 to vector<8x128xf32>
    %42 = arith.addf %41, %40 : vector<8x128xf32>
    %43 = arith.divf %41, %42 : vector<8x128xf32>
    %c0_35 = arith.constant 0 : index
    %c0_36 = arith.constant 0 : index
    %44 = vector.load %arg7[%c0_35, %c0_36] : memref<8x128xf32, #tpu.memory_space<vmem>>, vector<8x128xf32>
    tpu.vector_store %arg7[%c0_35, %c0_36], %43 {strides = array<i32>} : memref<8x128xf32, #tpu.memory_space<vmem>>, vector<8x128xf32>,
    return
  }
}

</mosaic_0001>

<bundles_post_ra>
// kernel: tpu_custom_call.1
= control target key start
LH: loop header
LB: loop body
LE: loop exit
PB: predicated region body
PF: predicated region fallthrough
CT: control target
= control target key end

     0   :  { %12 = vsyncpa [#allocation4], 0  ;;  %s1100_s0 = inlined_call_operand.hbm [shape: f32[8,128], index: 0, kind: input, shape index: {}]   ;;  %s1101_s1 = inlined_call_operand.hbm [shape: f32[128,128], index: 1, kind: input, shape index: {}]   ;;  %s1102_s2 = inlined_call_operand.vmem [shape: f32[1,128], index: 2, kind: input, shape index: {}]   ;;  %s1103_s3 = inlined_call_operand.hbm [shape: f32[2,128,128], index: 3, kind: input, shape index: {}]   ;;  %s1104_s4 = inlined_call_operand.vmem [shape: f32[2,1,128], index: 4, kind: input, shape index: {}]   ;;  %s1105_s5 = inlined_call_operand.hbm [shape: f32[128,128], index: 5, kind: input, shape index: {}]   ;;  %s1106_s6 = inlined_call_operand.vmem [shape: f32[1,128], index: 6, kind: input, shape index: {}]   ;;  %s1107_s7 = inlined_call_operand.hbm [shape: f32[8,128], index: 7, kind: output, shape index: {}]  }
   0x1   :  { %13 = vsyncpa [#allocation7], 0 }
   0x2   :  { %14 = vsyncpa [#allocation10], 0 }
   0x3   :  { %15 = vsyncpa [#allocation5], 0  ;;  %s929_s24 = smov [#allocation6]   ;;  %s811_s28 = scalar_lea.hbm %s1101_s1, 2048 }
   0x4   :  { %s31_s25 = sshll.u32 %s929_s24, 4  ;;  %p812_p0 = scmp.ne.s32.totalorder %s1101_s1, %s811_s28  ;;  %s32_s25 = int_to_ptr.vmem [resolvable:$true] %s31_s25 }
   0x5   :  { %p815_p1 = scmp.lt.u32.totalorder %s811_s28, %s1101_s1 }
   0x7   :  { %p817_p2 = pnand %p815_p1, %p812_p0 }
   0x9   :  { %820 = shalt.err (!%p817_p2)
}
   0xa   :  { %s821_s10 = scalar_lea.vmem %s32_s25, 2048  ;;  %p826_p4 = scmp.lt.s32.totalorder %s32_s25, %s32_s25 }
   0xb   :  { %p822_p3 = scmp.ne.s32.totalorder %s32_s25, %s821_s10  ;;  %p827_p5 = scmp.lt.s32.totalorder %s821_s10, %s821_s10 }
   0xd   :  { %p828_p6 = por %p827_p5, %p826_p4 }
   0xf   :  { %p829_p7 = pnand %p828_p6, %p822_p3 }
  0x11   :  { %832 = shalt.err (!%p829_p7)
}
  0x12   :  { %s930_s11 = smov 128   ;;  %s931_s12 = smov 8  }
  0x13   :  { %37 = dma.hbm_to_vmem [thread:$0]  %s1101_s1, 2048, %s32_s25, [#allocation7], %s930_s11, %s930_s11, %s931_s12  }
  0x14   :  { %s932_s15 = smov [#allocation3]   ;;  %s933_s17 = smov [#allocation8]  }
  0x15   :  { %s22_s16 = sshll.u32 %s932_s15, 4  ;;  %s45_s18 = sshll.u32 %s933_s17, 4  ;;  %s23_s16 = int_to_ptr.vmem [resolvable:$true] %s22_s16  ;;  %s46_s18 = int_to_ptr.vmem [resolvable:$true] %s45_s18 }
  0x16   :  { %s833_s21 = scalar_lea.hbm %s1100_s0, 128 }
  0x17   :  { %p834_p8 = scmp.ne.s32.totalorder %s1100_s0, %s833_s21  ;;  %p837_p9 = scmp.lt.u32.totalorder %s833_s21, %s1100_s0 }
  0x19   :  { %p839_p10 = pnand %p837_p9, %p834_p8 }
  0x1b   :  { %842 = shalt.err (!%p839_p10)
}
  0x1c   :  { %s843_s1 = scalar_lea.vmem %s23_s16, 128  ;;  %p848_p12 = scmp.lt.s32.totalorder %s23_s16, %s23_s16 }
  0x1d   :  { %p844_p11 = scmp.ne.s32.totalorder %s23_s16, %s843_s1  ;;  %p849_p13 = scmp.lt.s32.totalorder %s843_s1, %s843_s1 }
  0x1f   :  { %p850_p0 = por %p849_p13, %p848_p12 }
  0x21   :  { %p851_p1 = pnand %p850_p0, %p844_p11 }
  0x23   :  { %854 = shalt.err (!%p851_p1)
}
  0x24   :  { %25 = dma.hbm_to_vmem [thread:$0]  %s1100_s0, 128, %s23_s16, [#allocation4]  }
  0x25   :  { %s855_s30 = scalar_lea.hbm %s1103_s3, 4096 }
  0x26   :  { %p856_p2 = scmp.ne.s32.totalorder %s1103_s3, %s855_s30  ;;  %p859_p3 = scmp.lt.u32.totalorder %s855_s30, %s1103_s3 }
  0x28   :  { %p861_p4 = pnand %p859_p3, %p856_p2 }
  0x2a   :  { %864 = shalt.err (!%p861_p4)
}
  0x2b   :  { %s865_s14 = scalar_lea.vmem %s46_s18, 4096  ;;  %p870_p6 = scmp.lt.s32.totalorder %s46_s18, %s46_s18 }
  0x2c   :  { %p866_p5 = scmp.ne.s32.totalorder %s46_s18, %s865_s14  ;;  %p871_p7 = scmp.lt.s32.totalorder %s865_s14, %s865_s14 }
  0x2e   :  { %p872_p8 = por %p871_p7, %p870_p6 }
  0x30   :  { %p873_p9 = pnand %p872_p8, %p866_p5 }
  0x32   :  { %876 = shalt.err (!%p873_p9)
}
  0x33   :  { %51 = dma.hbm_to_vmem [thread:$0]  %s1103_s3, 4096, %s46_s18, [#allocation7], %s930_s11, %s930_s11, %s931_s12  }
  0x34   :  { %s934_s16 = smov [#allocation9]   ;;  %s877_s21 = scalar_lea.hbm %s1105_s5, 2048 }
  0x35   :  { %s59_s17 = sshll.u32 %s934_s16, 4  ;;  %p878_p10 = scmp.ne.s32.totalorder %s1105_s5, %s877_s21  ;;  %s60_s17 = int_to_ptr.vmem [resolvable:$true] %s59_s17 }
  0x36   :  { %p881_p11 = scmp.lt.u32.totalorder %s877_s21, %s1105_s5 }
  0x38   :  { %p883_p12 = pnand %p881_p11, %p878_p10 }
  0x3a   :  { %886 = shalt.err (!%p883_p12)
}
  0x3b   :  { %s887_s1 = scalar_lea.vmem %s60_s17, 2048  ;;  %p892_p0 = scmp.lt.s32.totalorder %s60_s17, %s60_s17 }
  0x3c   :  { %p888_p13 = scmp.ne.s32.totalorder %s60_s17, %s887_s1  ;;  %p893_p1 = scmp.lt.s32.totalorder %s887_s1, %s887_s1 }
  0x3e   :  { %p894_p2 = por %p893_p1, %p892_p0 }
  0x40   :  { %p895_p3 = pnand %p894_p2, %p888_p13 }
  0x42   :  { %898 = shalt.err (!%p895_p3)
}
  0x43   :  { %65 = dma.hbm_to_vmem [thread:$0]  %s1105_s5, 2048, %s60_s17, [#allocation10], %s930_s11, %s930_s11, %s931_s12  }
  0x44   :  { %921 = dma.done.wait [#allocation4], 128  }
  0x45   :  { %922 = vsyncadd [#allocation4], 4294967168 }
  0x46   :  { %923 = dma.done.wait [#allocation7], 6144  }
  0x47   :  { %924 = vsyncadd [#allocation7], 4294961152 }
  0x48   :  { %925 = dma.done.wait [#allocation10], 2048  }
  0x49   :  { %926 = vsyncadd [#allocation10], 4294965248  ;;  %v935_v0 = vmov 0.0|0.0   ;;  %vm936_vm0 = vmmov 0   ;;  %v937_v1 = vmov 0.0   ;;  %v81_v2 = vld [vmem:[#allocation6] sm:$0xff] }
  0x4a   :  { %701 = vmatprep.subr.bf16.mxu0 %v935_v0  ;;  %593 = vmatprep.mubr.msk.f32.mxu0 %vm936_vm0, %v937_v1  ;;  %v82_v3 = vld [vmem:[#allocation6 + $0x8] sm:$0xff]  ;;  %v83_v4 = vld [vmem:[#allocation6 + $0x10] sm:$0xff]  ;;  %v84_v6 = vld [vmem:[#allocation6 + $0x18] sm:$0xff]  ;;  %s938_s30 = smov [#allocation11]  }
  0x4b   :  { %725 = vmatprep.subr.bf16.mxu1 %v935_v0  ;;  %628 = vmatprep.mubr.msk.f32.mxu1 %vm936_vm0, %v937_v1  ;;  %v702_v5 = vpack.c.bf16 %v82_v3, %v81_v2  ;;  %v705_v7 = vpack.c.bf16 %v84_v6, %v83_v4  ;;  %v85_v8 = vld [vmem:[#allocation6 + $0x20] sm:$0xff]  ;;  %v86_v9 = vld [vmem:[#allocation6 + $0x28] sm:$0xff]  ;;  %v178_v12 = vld [vmem:[#allocation8 + $0x10] sm:$0xff]  ;;  %s476_s8 = sshll.u32 %s938_s30, 4  ;;  %s477_s8 = int_to_ptr.vmem [resolvable:$true] %s476_s8 }
  0x4c   :  { %v176_v10 = vld [vmem:[#allocation8] sm:$0xff]  ;;  %v177_v11 = vld [vmem:[#allocation8 + $0x8] sm:$0xff]  ;;  %v179_v13 = vld [vmem:[#allocation8 + $0x18] sm:$0xff]  ;;  %v708_v14 = vpack.c.bf16 %v86_v9, %v85_v8  ;;  %p904_p5 = scmp.lt.s32.totalorder %s477_s8, %s477_s8 }
  0x4d   :  { %703 = vmatpush3.bf16.msra.mxu0 %v702_v5  ;;  %v726_v15 = vpack.c.bf16 %v177_v11, %v176_v10  ;;  %v87_v16 = vld [vmem:[#allocation6 + $0x30] sm:$0xff]  ;;  %v88_v17 = vld [vmem:[#allocation6 + $0x38] sm:$0xff]  ;;  %v729_v18 = vpack.c.bf16 %v179_v13, %v178_v12  ;;  %v180_v19 = vld [vmem:[#allocation8 + $0x20] sm:$0xff] }
  0x4e   :  { %704 = vmatprep.subr.bf16.mxu0 %v935_v0  ;;  %v181_v20 = vld [vmem:[#allocation8 + $0x28] sm:$0xff]  ;;  %v711_v21 = vpack.c.bf16 %v88_v17, %v87_v16  ;;  %v89_v22 = vld [vmem:[#allocation6 + $0x40] sm:$0xff]  ;;  %v182_v25 = vld [vmem:[#allocation8 + $0x30] sm:$0xff] }
  0x4f   :  { %727 = vmatpush3.bf16.msra.mxu1 %v726_v15  ;;  %v90_v23 = vld [vmem:[#allocation6 + $0x48] sm:$0xff]  ;;  %v732_v24 = vpack.c.bf16 %v181_v20, %v180_v19  ;;  %v183_v26 = vld [vmem:[#allocation8 + $0x38] sm:$0xff]  ;;  %v91_v28 = vld [vmem:[#allocation6 + $0x50] sm:$0xff] }
  0x50   :  { %728 = vmatprep.subr.bf16.mxu1 %v935_v0  ;;  %v714_v27 = vpack.c.bf16 %v90_v23, %v89_v22  ;;  %v92_v29 = vld [vmem:[#allocation6 + $0x58] sm:$0xff]  ;;  %v735_v30 = vpack.c.bf16 %v183_v26, %v182_v25  ;;  %v184_v31 = vld [vmem:[#allocation8 + $0x40] sm:$0xff]  ;;  %v185_v32 = vld [vmem:[#allocation8 + $0x48] sm:$0xff] }
  0x51   :  { %706 = vmatpush3.bf16.msra.mxu0 %v705_v7  ;;  %v717_v33 = vpack.c.bf16 %v92_v29, %v91_v28  ;;  %v93_v34 = vld [vmem:[#allocation6 + $0x60] sm:$0xff]  ;;  %v94_v35 = vld [vmem:[#allocation6 + $0x68] sm:$0xff]  ;;  %v738_v36 = vpack.c.bf16 %v185_v32, %v184_v31  ;;  %v186_v37 = vld [vmem:[#allocation8 + $0x50] sm:$0xff] }
  0x52   :  { %707 = vmatprep.subr.bf16.mxu0 %v935_v0  ;;  %v187_v38 = vld [vmem:[#allocation8 + $0x58] sm:$0xff]  ;;  %v720_v39 = vpack.c.bf16 %v94_v35, %v93_v34  ;;  %v95_v40 = vld [vmem:[#allocation6 + $0x70] sm:$0xff]  ;;  %v188_v43 = vld [vmem:[#allocation8 + $0x60] sm:$0xff] }
  0x53   :  { %730 = vmatpush3.bf16.msra.mxu1 %v729_v18  ;;  %v96_v41 = vld [vmem:[#allocation6 + $0x78] sm:$0xff]  ;;  %v741_v42 = vpack.c.bf16 %v187_v38, %v186_v37  ;;  %v189_v44 = vld [vmem:[#allocation8 + $0x68] sm:$0xff]  ;;  %v190_v48 = vld [vmem:[#allocation8 + $0x70] sm:$0xff] }
  0x54   :  { %731 = vmatprep.subr.bf16.mxu1 %v935_v0  ;;  %v723_v45 = vpack.c.bf16 %v96_v41, %v95_v40  ;;  %v744_v46 = vpack.c.bf16 %v189_v44, %v188_v43  ;;  %v80_v47 = vld [vmem:[#allocation3] sm:$0xff]  ;;  %v273_v51 = vld [vmem:[#allocation8 + $0x80] sm:$0xff]  ;;  %v274_v52 = vld [vmem:[#allocation8 + $0x88] sm:$0xff] }
  0x55   :  { %709 = vmatpush3.bf16.msra.mxu0 %v708_v14  ;;  %v191_v49 = vld [vmem:[#allocation8 + $0x78] sm:$0xff]  ;;  %v275_v53 = vld [vmem:[#allocation8 + $0x90] sm:$0xff]  ;;  %v750_v54 = vpack.c.bf16 %v274_v52, %v273_v51  ;;  %v277_v57 = vld [vmem:[#allocation8 + $0xa0] sm:$0xff] }
  0x56   :  { %710 = vmatprep.subr.bf16.mxu0 %v935_v0  ;;  %v747_v50 = vpack.c.bf16 %v191_v49, %v190_v48  ;;  %v276_v55 = vld [vmem:[#allocation8 + $0x98] sm:$0xff]  ;;  %v278_v58 = vld [vmem:[#allocation8 + $0xa8] sm:$0xff]  ;;  %v279_v60 = vld [vmem:[#allocation8 + $0xb0] sm:$0xff] }
  0x57   :  { %733 = vmatpush3.bf16.msra.mxu1 %v732_v24  ;;  %v753_v56 = vpack.c.bf16 %v276_v55, %v275_v53  ;;  %v756_v59 = vpack.c.bf16 %v278_v58, %v277_v57  ;;  %v280_v61 = vld [vmem:[#allocation8 + $0xb8] sm:$0xff]  ;;  %v281_v63 = vld [vmem:[#allocation8 + $0xc0] sm:$0xff]  ;;  %v282_v2 = vld [vmem:[#allocation8 + $0xc8] sm:$0xff] }
  0x58   :  { %734 = vmatprep.subr.bf16.mxu1 %v935_v0  ;;  %v759_v62 = vpack.c.bf16 %v280_v61, %v279_v60  ;;  %v762_v3 = vpack.c.bf16 %v282_v2, %v281_v63  ;;  %v283_v4 = vld [vmem:[#allocation8 + $0xd0] sm:$0xff]  ;;  %v284_v5 = vld [vmem:[#allocation8 + $0xd8] sm:$0xff]  ;;  %v285_v7 = vld [vmem:[#allocation8 + $0xe0] sm:$0xff] }
  0x59   :  { %712 = vmatpush3.bf16.msra.mxu0 %v711_v21  ;;  %v765_v6 = vpack.c.bf16 %v284_v5, %v283_v4  ;;  %v286_v8 = vld [vmem:[#allocation8 + $0xe8] sm:$0xff]  ;;  %v487_v10 = vld [vmem:[%s1102_s2] ss:$0 sm:$0xff]  ;;  %v287_v14 = vld [vmem:[#allocation8 + $0xf0] sm:$0xff] }
  0x5a   :  { %713 = vmatprep.subr.bf16.mxu0 %v935_v0  ;;  %v768_v9 = vpack.c.bf16 %v286_v8, %v285_v7  ;;  %v288_v15 = vld [vmem:[#allocation8 + $0xf8] sm:$0xff]  ;;  %v370_v17 = vld [vmem:[#allocation9] sm:$0xff]  ;;  %v371_v18 = vld [vmem:[#allocation9 + $0x8] sm:$0xff] }
  0x5b   :  { %736 = vmatpush3.bf16.msra.mxu1 %v735_v30  ;;  %v771_v16 = vpack.c.bf16 %v288_v15, %v287_v14  ;;  %v372_v19 = vld [vmem:[#allocation9 + $0x10] sm:$0xff]  ;;  %v774_v20 = vpack.c.bf16 %v371_v18, %v370_v17  ;;  %v373_v21 = vld [vmem:[#allocation9 + $0x18] sm:$0xff]  ;;  %v374_v23 = vld [vmem:[#allocation9 + $0x20] sm:$0xff] }
  0x5c   :  { %737 = vmatprep.subr.bf16.mxu1 %v935_v0  ;;  %v777_v22 = vpack.c.bf16 %v373_v21, %v372_v19  ;;  %v375_v24 = vld [vmem:[#allocation9 + $0x28] sm:$0xff]  ;;  %v377_v26 = vld [vmem:[#allocation9 + $0x38] sm:$0xff]  ;;  %v378_v28 = vld [vmem:[#allocation9 + $0x40] sm:$0xff] }
  0x5d   :  { %715 = vmatpush3.bf16.msra.mxu0 %v714_v27  ;;  %v780_v25 = vpack.c.bf16 %v375_v24, %v374_v23  ;;  %v379_v29 = vld [vmem:[#allocation9 + $0x48] sm:$0xff]  ;;  %v380_v31 = vld [vmem:[#allocation9 + $0x50] sm:$0xff]  ;;  %v381_v32 = vld [vmem:[#allocation9 + $0x58] sm:$0xff] }
  0x5e   :  { %716 = vmatprep.subr.bf16.mxu0 %v935_v0  ;;  %v786_v30 = vpack.c.bf16 %v379_v29, %v378_v28  ;;  %v382_v34 = vld [vmem:[#allocation9 + $0x60] sm:$0xff]  ;;  %v383_v35 = vld [vmem:[#allocation9 + $0x68] sm:$0xff]  ;;  %v488_v37 = vld [vmem:[%s1104_s4] ss:$0 sm:$0xff] }
  0x5f   :  { %739 = vmatpush3.bf16.msra.mxu1 %v738_v36  ;;  %v792_v36 = vpack.c.bf16 %v383_v35, %v382_v34  ;;  %v385_v43 = vld [vmem:[#allocation9 + $0x78] sm:$0xff] }
  0x60   :  { %740 = vmatprep.subr.bf16.mxu1 %v935_v0  ;;  %v491_v49 = vld [vmem:[%s1106_s6] ss:$0 sm:$0xff] }
  0x61   :  { %718 = vmatpush3.bf16.msra.mxu0 %v717_v33  ;;  %v789_v33 = vpack.c.bf16 %v381_v32, %v380_v31 }
  0x62   :  { %719 = vmatprep.subr.bf16.mxu0 %v935_v0 }
  0x63   :  { %742 = vmatpush3.bf16.msra.mxu1 %v741_v42  ;;  %v384_v42 = vld [vmem:[#allocation9 + $0x70] sm:$0xff] }
  0x64   :  { %743 = vmatprep.subr.bf16.mxu1 %v935_v0  ;;  %v795_v44 = vpack.c.bf16 %v385_v43, %v384_v42 }
  0x65   :  { %721 = vmatpush3.bf16.msra.mxu0 %v720_v39 }
  0x66   :  { %722 = vmatprep.subr.bf16.mxu0 %v935_v0 }
  0x67   :  { %745 = vmatpush3.bf16.msra.mxu1 %v744_v46 }
  0x68   :  { %746 = vmatprep.subr.bf16.mxu1 %v935_v0 }
  0x69   :  { %724 = vmatpush3.bf16.msra.mxu0 %v723_v45  ;;  %v490_v45 = vld [vmem:[%s1104_s4 + $0x1] ss:$0 sm:$0xff]  ;;  %s899_s4 = scalar_lea.vmem %s477_s8, 128 }
  0x6a   :  { %749 = vmatprep.subr.bf16.mxu0 %v935_v0  ;;  %p900_p4 = scmp.ne.s32.totalorder %s477_s8, %s899_s4  ;;  %p905_p6 = scmp.lt.s32.totalorder %s899_s4, %s899_s4 }
  0x6b   :  { %748 = vmatpush3.bf16.msra.mxu1 %v747_v50 }
  0x6c   :  { %594 = vmatmul.mubr.f32.vlgmr.msra.gmra.mrb[0].mxu0 %v80_v47  ;;  %773 = vmatprep.subr.bf16.mxu1 %v935_v0  ;;  %p906_p7 = por %p905_p6, %p904_p5 }
  0x6d   :  { %663 = vmatprep.mubr.msk.f32.mxu0 %vm936_vm0, %v937_v1  ;;  %751 = vmatpush3.bf16.msra.mxu0 %v750_v54 }
  0x6e   :  { %752 = vmatprep.subr.bf16.mxu0 %v935_v0  ;;  %p907_p8 = pnand %p906_p7, %p900_p4 }
  0x71   :  { %754 = vmatpush3.bf16.msra.mxu0 %v753_v56 }
  0x72   :  { %755 = vmatprep.subr.bf16.mxu0 %v935_v0 }
  0x75   :  { %757 = vmatpush3.bf16.msra.mxu0 %v756_v59 }
  0x76   :  { %758 = vmatprep.subr.bf16.mxu0 %v935_v0 }
  0x79   :  { %760 = vmatpush3.bf16.msra.mxu0 %v759_v62 }
  0x7a   :  { %761 = vmatprep.subr.bf16.mxu0 %v935_v0 }
  0x7d   :  { %763 = vmatpush3.bf16.msra.mxu0 %v762_v3 }
  0x7e   :  { %764 = vmatprep.subr.bf16.mxu0 %v935_v0 }
  0x81   :  { %766 = vmatpush3.bf16.msra.mxu0 %v765_v6 }
  0x82   :  { %767 = vmatprep.subr.bf16.mxu0 %v935_v0 }
  0x85   :  { %769 = vmatpush3.bf16.msra.mxu0 %v768_v9 }
  0x86   :  { %770 = vmatprep.subr.bf16.mxu0 %v935_v0 }
  0x89   :  { %772 = vmatpush3.bf16.msra.mxu0 %v771_v16 }
 0x13f   :  { %v170_v11 = vpop.f32.mrb[0].mxu0 }
 0x140   :  { %v171_v12 = vadd.f32 %v487_v10, %v170_v11  ;;  %v595_v13 = vpop.f32.mrb[1].mxu0 }
 0x142   :  { %629 = vmatmul.mubr.f32.vlgmr.msra.gmra.mrb[0].mxu1 %v171_v12 }
 0x143   :  { %698 = vmatprep.mubr.msk.f32.mxu1 %vm936_vm0, %v937_v1  ;;  %775 = vmatpush3.bf16.msra.mxu1 %v774_v20  ;;  %v376_v1 = vld [vmem:[#allocation9 + $0x30] sm:$0xff] }
 0x144   :  { %776 = vmatprep.subr.bf16.mxu1 %v935_v0  ;;  %v783_v27 = vpack.c.bf16 %v377_v26, %v376_v1 }
 0x147   :  { %778 = vmatpush3.bf16.msra.mxu1 %v777_v22 }
 0x148   :  { %779 = vmatprep.subr.bf16.mxu1 %v935_v0 }
 0x14b   :  { %781 = vmatpush3.bf16.msra.mxu1 %v780_v25 }
 0x14c   :  { %782 = vmatprep.subr.bf16.mxu1 %v935_v0 }
 0x14f   :  { %784 = vmatpush3.bf16.msra.mxu1 %v783_v27 }
 0x150   :  { %785 = vmatprep.subr.bf16.mxu1 %v935_v0 }
 0x153   :  { %787 = vmatpush3.bf16.msra.mxu1 %v786_v30 }
 0x154   :  { %788 = vmatprep.subr.bf16.mxu1 %v935_v0 }
 0x157   :  { %790 = vmatpush3.bf16.msra.mxu1 %v789_v33 }
 0x158   :  { %791 = vmatprep.subr.bf16.mxu1 %v935_v0 }
 0x15b   :  { %793 = vmatpush3.bf16.msra.mxu1 %v792_v36 }
 0x15c   :  { %794 = vmatprep.subr.bf16.mxu1 %v935_v0 }
 0x15f   :  { %796 = vmatpush3.bf16.msra.mxu1 %v795_v44 }
 0x215   :  { %v265_v38 = vpop.f32.mrb[0].mxu1 }
 0x216   :  { %v266_v39 = vadd.f32 %v488_v37, %v265_v38  ;;  %v630_v40 = vpop.f32.mrb[1].mxu1 }
 0x218   :  { %v269_v41 = vmax.f32 %v266_v39, 0.0 }
 0x21a   :  { %664 = vmatmul.mubr.f32.vlgmr.msra.gmra.mrb[2].mxu0 %v269_v41 }
 0x2ed   :  { %v363_v46 = vpop.f32.mrb[2].mxu0 }
 0x2ee   :  { %v364_v47 = vadd.f32 %v490_v45, %v363_v46  ;;  %v665_v0 = vpop.f32.mrb[3].mxu0 }
 0x2f0   :  { %v367_v48 = vmax.f32 %v364_v47, 0.0 }
 0x2f2   :  { %699 = vmatmul.mubr.f32.vlgmr.msra.gmra.mrb[2].mxu1 %v367_v48 }
 0x3c5   :  { %v459_v50 = vpop.f32.mrb[2].mxu1 }
 0x3c6   :  { %v460_v51 = vadd.f32 %v491_v49, %v459_v50  ;;  %v700_v52 = vpop.f32.mrb[3].mxu1 }
 0x3c8   :  { %v492_v53 = vmul.f32 -1.442695, %v460_v51 }
 0x3ca   :  { %807 = vpow2.f32 %v492_v53 }
 0x3d4   :  { %v808_v54 = vpop.eup %807 }
 0x3d5   :  { %v466_v55 = vadd.f32 1.0, %v808_v54 }
 0x3d7   :  { %809 = vrcp.f32 %v466_v55 }
 0x3e1   :  { %v810_v56 = vpop.eup %809 }
 0x3e2   :  { %469 = vst [vmem:[#allocation11] sm:$0xff] %v810_v56 }
 0x3e3   :  { %910 = shalt.err (!%p907_p8)
}
 0x3e4   :  { %s911_s10 = scalar_lea.hbm %s1107_s7, 128 }
 0x3e5   :  { %p912_p9 = scmp.ne.s32.totalorder %s1107_s7, %s911_s10  ;;  %p915_p10 = scmp.lt.u32.totalorder %s911_s10, %s1107_s7 }
 0x3e7   :  { %p917_p11 = pnand %p915_p10, %p912_p9 }
 0x3e9   :  { %920 = shalt.err (!%p917_p11)
}
 0x3ea   :  { %479 = dma.vmem_to_hbm [thread:$0]  %s477_s8, 128, %s1107_s7, [#allocation5]  }
 0x3eb   :  { %927 = dma.done.wait [#allocation5], 128  }
 0x3ec   :  { %928 = vsyncadd [#allocation5], 4294967168 }
 0x3ed   :  { %483 = vsyncpa [#allocation4], 1 }
 0x3ee   :  { %484 = vsyncpa [#allocation7], 1 }
 0x3ef   :  { %485 = vsyncpa [#allocation10], 1 }
 0x3f0   :  { %486 = vsyncpa [#allocation5], 1 }

</bundles_post_ra>
